<compile_context>
chip_gen: v6e
topology: v6e:2x2x1
jax: 0.10.0
libtpu: 0.0.40
codegen_flags: <defaults>
</compile_context>

<pallas_src>
import functools

import jax
import jax.numpy as jnp
from jax.experimental import pallas as pl
from jax.experimental.pallas import tpu as pltpu

VOCAB = 128   # synthetic vocab size (lane-aligned)
HIDDEN = 32   # synthetic hidden size


# --------------------------------------------------------------------------------------
# Fused LM-loss kernel. One grid step handles one group of G sequences:
#   logits = h @ W                     (one (G*T, H) x (H, V) MXU pass, bf16 in / f32 out)
#   tok_t  = logsumexp(logits_t) - logits_t[target_t]      (unshifted, as in the torch module)
#   loss_g = sum over valid (non-padded) tokens of sequence g
# --------------------------------------------------------------------------------------
def _lm_loss_kernel(ids_ref, h_ref, w_ref, loss_ref, *, seq_len):
    # ids_ref : (G*T, 1) int32   target ids; -1 marks fusion-padding (masked out)
    # h_ref   : (G*T, H) bf16    hidden states, batch*seq folded into matmul M dim
    # w_ref   : (H, V)   bf16    LM-head weight (shared across grid steps)
    # loss_ref: (1, G, 1) f32    per-sequence summed LM loss
    m_rows = h_ref.shape[0]
    v = w_ref.shape[1]

    logits = jnp.dot(h_ref[...], w_ref[...],
                     preferred_element_type=jnp.float32)                 # (M, V) f32 on MXU

    ids = ids_ref[...]                                                   # (M, 1) int32
    mx = jnp.max(logits, axis=-1, keepdims=True)                         # (M, 1)
    shifted = logits - mx
    sumexp = jnp.sum(jnp.exp(shifted), axis=-1, keepdims=True)           # (M, 1)
    col = jax.lax.broadcasted_iota(jnp.int32, (m_rows, v), 1)
    tgt_shift = jnp.sum(jnp.where(col == ids, shifted, 0.0),
                        axis=-1, keepdims=True)                          # (M, 1)

    # per-token CE = (mx + log sumexp) - (mx + tgt_shift); the running max cancels.
    valid = (ids >= 0).astype(jnp.float32)                               # fusion-padding mask
    tok = (jnp.log(sumexp) - tgt_shift) * valid                          # (M, 1)

    # Per-sequence sum: split rows into (G, T, 1). Layout-preserving since seq_len % 8 == 0.
    g = m_rows // seq_len
    seq = jnp.sum(tok.reshape(g, seq_len, 1), axis=1)                    # (G, 1)
    loss_ref[...] = seq[None]                                            # (1, G, 1)


def lm_loss_fused(ids, wte, wpe, w_head, *, num_groups=2):
    """Per-sequence LM loss for a fused batch of N sequences (padded ids marked with -1).

    Matches CausalClassifier.lm_loss: per-token CE (no shift), summed over the sequence.
    """
    N, T = ids.shape
    H = wte.shape[1]
    V = w_head.shape[1]
    assert N % num_groups == 0, "fused sequence count must split evenly across grid groups"
    assert T % 8 == 0, "sequence length must be sublane-aligned"
    G = N // num_groups

    # Glue: synthetic GPT-2 trunk stand-in (token + positional embedding).
    # TODO(synk): real GPT-2 transformer trunk not reproducible here.
    h = jnp.take(wte, jnp.maximum(ids, 0), axis=0) + wpe[:T][None, :, :]  # (N, T, H) f32
    h = h.reshape(N * T, H).astype(jnp.bfloat16)     # fold batch*seq into M; bf16 MXU inputs
    w = w_head.astype(jnp.bfloat16)
    ids_col = ids.astype(jnp.int32).reshape(N * T, 1)

    kernel = functools.partial(_lm_loss_kernel, seq_len=T)
    out = pl.pallas_call(
        kernel,
        out_shape=jax.ShapeDtypeStruct((num_groups, G, 1), jnp.float32),
        grid_spec=pltpu.PrefetchScalarGridSpec(
            num_scalar_prefetch=0,
            grid=(num_groups,),
            in_specs=[
                pl.BlockSpec((G * T, 1), lambda g: (g, 0)),   # target ids (+ padding mask)
                pl.BlockSpec((G * T, H), lambda g: (g, 0)),   # hidden states
                pl.BlockSpec((H, V), lambda g: (0, 0)),       # LM-head weight (shared)
            ],
            out_specs=pl.BlockSpec((1, G, 1), lambda g: (g, 0, 0)),
        ),
        compiler_params=pltpu.CompilerParams(dimension_semantics=("parallel",)),
    )(ids_col, h, w)
    return out.reshape(N)                                                 # (N,)


# --------------------------------------------------------------------------------------
# Full forward pass (pre-tokenized inputs stand in for tokenizer(prompt) / tokenizer(whole)).
# --------------------------------------------------------------------------------------
def causal_classifier_forward(params,
                              neutral_prompt_ids, toxic_prompt_ids,
                              neutral_whole_ids, toxic_whole_ids,
                              labels):
    wte, wpe, w_head = params
    B, T = neutral_whole_ids.shape
    Tp = neutral_prompt_ids.shape[1]

    # Fuse the four lm_loss batches into one (N=4B, T) call; pad prompts with -1 (masked).
    pad = jnp.full((B, T - Tp), -1, dtype=jnp.int32)
    np_pad = jnp.concatenate([neutral_prompt_ids.astype(jnp.int32), pad], axis=1)
    tp_pad = jnp.concatenate([toxic_prompt_ids.astype(jnp.int32), pad], axis=1)
    # Order: [neutral_whole, neutral_prompt, toxic_whole, toxic_prompt]
    #        -> grid group 0 = all neutral work, group 1 = all toxic work.
    ids_all = jnp.concatenate(
        [neutral_whole_ids.astype(jnp.int32), np_pad,
         toxic_whole_ids.astype(jnp.int32), tp_pad], axis=0)              # (4B, T)

    losses = lm_loss_fused(ids_all, wte, wpe, w_head, num_groups=2)       # (4B,)
    neutral_scores = losses[0:B] - losses[B:2 * B]                        # whole - prompt
    toxic_scores = losses[2 * B:3 * B] - losses[3 * B:4 * B]

    # torch.stack(loss_scores).permute(1, 0) -> (B, 2): col 0 = neutral, col 1 = toxic
    scores = jnp.stack([neutral_scores, toxic_scores], axis=0).T          # (B, 2)

    # Classification head in plain JAX (a dedicated Pallas call here costs more than it computes).
    label_probs = jax.nn.softmax(-scores / 10.0, axis=1)                  # (B, 2)
    # nn.CrossEntropyLoss(reduction='mean') applied to the *probabilities* as logits (as in torch).
    logp = jax.nn.log_softmax(label_probs, axis=1)
    lbl = labels.astype(jnp.int32)[:, None]
    cls_loss = -jnp.mean(jnp.take_along_axis(logp, lbl, axis=1))
    predictions = jnp.argmax(label_probs, axis=1)
    return cls_loss, label_probs, predictions


if __name__ == "__main__":
    key = jax.random.PRNGKey(0)
    k_wte, k_wpe, k_wh, k_np, k_tp, k_txt = jax.random.split(key, 6)

    B = 2            # batch (number of texts)
    T_PROMPT = 8     # tokenized prompt length
    T_WHOLE = 16     # tokenized "prompt + text" length
    MAX_POS = 32

    # Deterministic synthetic "GPT-2" parameters (lm_head has no bias, as in GPT2LMHeadModel).
    wte = (0.02 * jax.random.normal(k_wte, (VOCAB, HIDDEN))).astype(jnp.float32)
    wpe = (0.02 * jax.random.normal(k_wpe, (MAX_POS, HIDDEN))).astype(jnp.float32)
    w_head = (0.02 * jax.random.normal(k_wh, (HIDDEN, VOCAB))).astype(jnp.float32)
    params = (wte, wpe, w_head)

    # Deterministic "tokenized" inputs: whole = [prompt tokens, text tokens].
    neutral_prompt_ids = jax.random.randint(k_np, (B, T_PROMPT), 0, VOCAB, dtype=jnp.int32)
    toxic_prompt_ids = jax.random.randint(k_tp, (B, T_PROMPT), 0, VOCAB, dtype=jnp.int32)
    text_ids = jax.random.randint(k_txt, (B, T_WHOLE - T_PROMPT), 0, VOCAB, dtype=jnp.int32)
    neutral_whole_ids = jnp.concatenate([neutral_prompt_ids, text_ids], axis=1)
    toxic_whole_ids = jnp.concatenate([toxic_prompt_ids, text_ids], axis=1)
    labels = jnp.array([0, 1], dtype=jnp.int32)

    fwd = jax.jit(causal_classifier_forward)
    cls_loss, label_probs, predictions = fwd(
        params, neutral_prompt_ids, toxic_prompt_ids,
        neutral_whole_ids, toxic_whole_ids, labels)
    jax.block_until_ready((cls_loss, label_probs, predictions))

    assert label_probs.shape == (B, 2)
    assert predictions.shape == (B,)
    assert cls_loss.shape == ()
    print("KERNEL_OK")
</pallas_src>

<mosaic_0001>
module attributes {stable_mosaic.version = 11 : i64} {
  func.func @_lm_loss_kernel(%arg0: i32, %arg1: memref<64x1xi32, #tpu.memory_space<vmem>>, %arg2: memref<64x32xbf16, #tpu.memory_space<vmem>>, %arg3: memref<32x128xbf16, #tpu.memory_space<vmem>>, %arg4: memref<1x4x1xf32, #tpu.memory_space<vmem>>) attributes {dimension_semantics = [#tpu.dimension_semantics<parallel>], iteration_bounds = array<i64: 2>, scalar_prefetch = 0 : i64, scratch_operands = 0 : i64, tpu.core_type = #tpu.core_type<tc>, window_params = [{transform_indices = @transform_0, window_bounds = array<i64: 64, 1>}, {transform_indices = @transform_1, window_bounds = array<i64: 64, 32>}, {pipeline_mode = #tpu.pipeline_mode<synchronous>, transform_indices = @transform_2, window_bounds = array<i64: 32, 128>}, {transform_indices = @transform_3, window_bounds = array<i64: 1, 4, 1>}]} {
    %c0 = arith.constant 0 : index
    %c0_0 = arith.constant 0 : index
    %0 = vector.load %arg2[%c0, %c0_0] : memref<64x32xbf16, #tpu.memory_space<vmem>>, vector<64x32xbf16>
    %c0_1 = arith.constant 0 : index
    %c0_2 = arith.constant 0 : index
    %1 = vector.load %arg3[%c0_1, %c0_2] : memref<32x128xbf16, #tpu.memory_space<vmem>>, vector<32x128xbf16>
    %cst = arith.constant dense<0.000000e+00> : vector<64x128xf32>
    %2 = tpu.matmul %0, %1, %cst {dimension_numbers = #tpu.dot_dimension_numbers<[1], [0], [0], [1], [0, 0, 1, 1], [], []>} : vector<64x32xbf16>, vector<32x128xbf16>, vector<64x128xf32> -> vector<64x128xf32>
    %c0_3 = arith.constant 0 : index
    %c0_4 = arith.constant 0 : index
    %3 = vector.load %arg1[%c0_3, %c0_4] : memref<64x1xi32, #tpu.memory_space<vmem>>, vector<64x1xi32>
    %cst_5 = arith.constant dense<0xFF800000> : vector<64xf32>
    %4 = vector.multi_reduction <maximumf>, %2, %cst_5 [1] : vector<64x128xf32> to vector<64xf32>
    %5 = vector.shape_cast %4 : vector<64xf32> to vector<64x1xf32>
    %6 = vector.broadcast %5 : vector<64x1xf32> to vector<64x128xf32>
    %7 = arith.subf %2, %6 : vector<64x128xf32>
    %8 = math.exp %7 : vector<64x128xf32>
    %cst_6 = arith.constant dense<0.000000e+00> : vector<64xf32>
    %9 = vector.multi_reduction <add>, %8, %cst_6 [1] : vector<64x128xf32> to vector<64xf32>
    %10 = vector.shape_cast %9 : vector<64xf32> to vector<64x1xf32>
    %11 = tpu.iota {dimensions = array<i32: 1>} : vector<64x128xi32>
    %12 = vector.broadcast %3 : vector<64x1xi32> to vector<64x128xi32>
    %13 = arith.cmpi eq, %11, %12 : vector<64x128xi32>
    %cst_7 = arith.constant 0.000000e+00 : f32
    %14 = vector.broadcast %cst_7 : f32 to vector<64x128xf32>
    %15 = arith.select %13, %7, %14 : vector<64x128xi1>, vector<64x128xf32>
    %cst_8 = arith.constant dense<0.000000e+00> : vector<64xf32>
    %16 = vector.multi_reduction <add>, %15, %cst_8 [1] : vector<64x128xf32> to vector<64xf32>
    %17 = vector.shape_cast %16 : vector<64xf32> to vector<64x1xf32>
    %c0_i32 = arith.constant 0 : i32
    %18 = vector.broadcast %c0_i32 : i32 to vector<64x1xi32>
    %19 = arith.cmpi sge, %3, %18 : vector<64x1xi32>
    %20 = arith.extui %19 : vector<64x1xi1> to vector<64x1xi32>
    %21 = arith.sitofp %20 : vector<64x1xi32> to vector<64x1xf32>
    %22 = math.log %10 : vector<64x1xf32>
    %23 = arith.subf %22, %17 : vector<64x1xf32>
    %24 = arith.mulf %23, %21 : vector<64x1xf32>
    %25 = vector.shape_cast %24 : vector<64x1xf32> to vector<4x16x1xf32>
    %cst_9 = arith.constant dense<0.000000e+00> : vector<4x1xf32>
    %26 = vector.multi_reduction <add>, %25, %cst_9 [1] : vector<4x16x1xf32> to vector<4x1xf32>
    %27 = vector.shape_cast %26 : vector<4x1xf32> to vector<1x4x1xf32>
    %c0_10 = arith.constant 0 : index
    %c0_11 = arith.constant 0 : index
    %c0_12 = arith.constant 0 : index
    %28 = vector.load %arg4[%c0_10, %c0_11, %c0_12] : memref<1x4x1xf32, #tpu.memory_space<vmem>>, vector<1x4x1xf32>
    tpu.vector_store %arg4[%c0_10, %c0_11, %c0_12], %27 {strides = array<i32>} : memref<1x4x1xf32, #tpu.memory_space<vmem>>, vector<1x4x1xf32>,
    return
  }
  func.func @transform_0(%arg0: i32) -> (i32, i32) {
    %c0_i32 = arith.constant 0 : i32
    %c0_i32_0 = arith.constant 0 : i32
    return %arg0, %c0_i32 : i32, i32
  }
  func.func @transform_1(%arg0: i32) -> (i32, i32) {
    %c0_i32 = arith.constant 0 : i32
    %c0_i32_0 = arith.constant 0 : i32
    return %arg0, %c0_i32 : i32, i32
  }
  func.func @transform_2(%arg0: i32) -> (i32, i32) {
    %c0_i32 = arith.constant 0 : i32
    %c0_i32_0 = arith.constant 0 : i32
    %c0_i32_1 = arith.constant 0 : i32
    return %c0_i32, %c0_i32_0 : i32, i32
  }
  func.func @transform_3(%arg0: i32) -> (i32, i32, i32) {
    %c0_i32 = arith.constant 0 : i32
    %c0_i32_0 = arith.constant 0 : i32
    %c0_i32_1 = arith.constant 0 : i32
    return %arg0, %c0_i32, %c0_i32_0 : i32, i32, i32
  }
}

</mosaic_0001>

<bundles_post_ra>
// kernel: causal_classifier_forward.1
= control target key start
LH: loop header
LB: loop body
LE: loop exit
PB: predicated region body
PF: predicated region fallthrough
CT: control target
= control target key end

     0   :  { %s741_s12 = smov 0   ;;  %s838_s0 = inlined_call_operand.vmem [shape: s32[128,1], index: 0, kind: input, shape index: {}]   ;;  %s839_s1 = inlined_call_operand.vmem [shape: bf16[128,32], index: 1, kind: input, shape index: {}]   ;;  %s840_s2 = inlined_call_operand.vmem [shape: bf16[32,128], index: 2, kind: input, shape index: {}]   ;;  %s841_s3 = inlined_call_operand.vmem [shape: f32[2,4,1], index: 3, kind: output, shape index: {}]  }
   0x1 LB: > { %s747_s13 = sadd.s32 4294967295, %s717_s12   ;;  %p613_p0 = scmp.ge.s32.totalorder %s717_s12, 1  ;;  %s717_s12 = sphi %s741_s12, %s13_s12  }
   0x2   : > { %p149_p1 = scmp.lt.s32.totalorder %s717_s12, 3 }
   0x4   : > { %p150_p2 = pnand %p613_p0, %p149_p1 }
   0x5   : > { %s614_s16 = sshll.u32 (!%p150_p2), %s747_s13, 3  ;;  %p189_p4 = scmp.lt.s32.totalorder (!%p150_p2), %s747_s13, 1 }
   0x6   : > { %153 = sbr.rel (%p150_p2) target bundleno = 625 (0x271), region = 32  ;;  %p178_p3 = scmp.lt.s32.totalorder (!%p150_p2), %s614_s16, 15 }
   0xb   : > { %v673_v0 = vld [vmem:[%s840_s2 + $0x8] sm:$0xff]   ;;  %v674_v1 = vld [vmem:[%s840_s2] sm:$0xff]   ;;  %s843_s16 = smov (!%p178_p3, %s614_s16), 15  ;;  %vm238_vm0 = vcmask 261120   ;;  %v719_v6 = vmov 0   ;;  %v380_v31 = vlaneseq  ;;  %vm494_vm13 = vcmask 7168  }
   0xc   : > { %645 = vmatprep.subr.bf16.mxu0 %v673_v0  ;;  %657 = vmatprep.subr.bf16.mxu1 %v673_v0  ;;  %s617_s19 = sshll.u32 %s843_s16, 2  ;;  %s615_s23 = sshll.u32 %s843_s16, 3 }
   0xd   : > { %646 = vmatpush3.bf16.msra.mxu0 %v673_v0  ;;  %659 = vmatpush3.bf16.msra.mxu1 %v673_v0  ;;  %s187_s22 = scalar_lea.vmem %s839_s1, %s617_s19  ;;  %s181_s26 = scalar_lea.vmem %s838_s0, %s615_s23  ;;  %v798_v37 = vand.u32 127, %v380_v31 }
   0xe   : > { %647 = vmatprep.subr.bf16.mxu0 %v674_v1  ;;  %658 = vmatprep.subr.bf16.mxu1 %v674_v1  ;;  %v675_v2 = vld [vmem:[%s187_s22] sm:$0xff]   ;;  %v676_v3 = vld [vmem:[%s187_s22 + $0x10] sm:$0xff]   ;;  %v677_v4 = vld [vmem:[%s187_s22 + $0x8] sm:$0xff]   ;;  %s845_s13 = smov (!%p189_p4, %s747_s13), 1 }
   0xf   : > { %649 = vmatprep.mubr.msk.bf16.mxu0 %vm238_vm0, %v675_v2  ;;  %653 = vmatprep.mubr.msk.bf16.mxu1 %vm238_vm0, %v676_v3  ;;  %v678_v5 = vld [vmem:[%s187_s22 + $0x18] sm:$0xff]   ;;  %v771_v14 = vld [vmem:[%s181_s26 + $0x8] sm:$0xff]  ;;  %v774_v15 = vld [vmem:[%s181_s26 + $0x10] sm:$0xff]  ;;  %s618_s27 = sshll.u32 %s845_s13, 2 }
  0x10   : > { %672 = vset.pattern.permute.xlu1 %v719_v6  ;;  %671 = vset.pattern.permute.xlu0 %v719_v6  ;;  %v777_v16 = vld [vmem:[%s181_s26 + $0x18] sm:$0xff]  ;;  %v780_v17 = vld [vmem:[%s181_s26] sm:$0xff]  ;;  %v786_v19 = vld [vmem:[%s181_s26 + $0x28] sm:$0xff]  ;;  %vm439_vm10 = vcmp.ge.s32.totalorder %v771_v14, 0  ;;  %vm440_vm11 = vcmp.ge.s32.totalorder %v774_v15, 0  ;;  %s192_s30 = scalar_lea.vmem %s841_s3, %s618_s27 }
  0x11   : > { %648 = vmatpush3.bf16.msra.mxu0 %v674_v1  ;;  %660 = vmatpush3.bf16.msra.mxu1 %v674_v1  ;;  %v782_v18 = vld [vmem:[%s181_s26 + $0x20] sm:$0xff]  ;;  %v792_v21 = vld [vmem:[%s181_s26 + $0x30] sm:$0xff]  ;;  %v795_v22 = vld [vmem:[%s181_s26 + $0x38] sm:$0xff]  ;;  %vm438_vm9 = vcmp.ge.s32.totalorder %v780_v17, 0  ;;  %vm441_vm12 = vcmp.ge.s32.totalorder %v777_v16, 0  ;;  %vm443_vm15 = vcmp.ge.s32.totalorder %v786_v19, 0 }
  0x12   : > { %vm442_vm14 = vcmp.ge.s32.totalorder %v782_v18, 0 }
  0x14   : > { %650 = vmatmul.mubr.msk.bf16.vlgmr.msra.gmra.mxu0 %vm238_vm0, %v677_v4  ;;  %654 = vmatmul.mubr.msk.bf16.vlgmr.msra.gmra.mxu1 %vm238_vm0, %v678_v5  ;;  %vm444_vm0 = vcmp.ge.s32.totalorder %v792_v21, 0 }
  0xd4   : > { %v651_v7 = vpop.f32.mrf.mxu0  ;;  %v655_v8 = vpop.f32.mrf.mxu1 }
  0xd5   : > { %328 = vmax.xlane.f32.xlu1 %v651_v7 }
  0xd6   : > { %v285_v9 = vpop.f32.mrf.mxu0  ;;  %v301_v10 = vpop.f32.mrf.mxu1 }
  0xd7   : > { %324 = vmax.xlane.f32.xlu0 %v285_v9 }
  0xd8   : > { %v652_v11 = vpop.f32.mrf.mxu0  ;;  %v764_v12 = vpop.f32.mrf.mxu1 }
  0xd9   : > { %330 = vmax.xlane.f32.xlu1 %v652_v11 }
  0xda   : > { %v288_v13 = vpop.f32.mrf.mxu0  ;;  %v789_v20 = vpop.f32.mrf.mxu1 }
  0xdb   : > { %332 = vmax.xlane.f32.xlu0 %v301_v10 }
  0xdd   : > { %338 = vmax.xlane.f32.xlu1 %v764_v12 }
  0xdf   : > { %326 = vmax.xlane.f32.xlu0 %v288_v13 }
  0xe3   : > { %336 = vmax.xlane.f32.xlu0 %v655_v8 }
  0xee   : > { %386 = vperm.xlu1 %672, %v771_v14  }
  0xf2   : > { %389 = vperm.xlu1 %672, %v774_v15  }
  0xf6   : > { %392 = vperm.xlu1 %672, %v777_v16  }
  0xf9   : > { %383 = vperm.xlu0 %671, %v780_v17  }
  0xfa   : > { %395 = vperm.xlu1 %672, %v782_v18  }
  0xfe   : > { %398 = vperm.xlu1 %672, %v786_v19  }
 0x122   : > { %334 = vmax.xlane.f32.xlu1 %v789_v20 }
 0x133   : > { %401 = vperm.xlu1 %672, %v792_v21  }
 0x137   : > { %404 = vperm.xlu1 %672, %v795_v22  }
 0x15e   : > { %v329_v23 = vpop.xlane.xlu1 %328 }
 0x15f   : > { %v342_v24 = vsub.f32 %v651_v7, %v329_v23 }
 0x160   : > { %v325_v25 = vpop.xlane.xlu0 %324 }
 0x161   : > { %v352_v26 = vmul.f32 1.442695, %v342_v24  ;;  %v340_v27 = vsub.f32 %v285_v9, %v325_v25 }
 0x162   : > { %v331_v28 = vpop.xlane.xlu1 %330 }
 0x163   : > { %679 = vpow2.f32 %v352_v26  ;;  %v348_v29 = vmul.f32 1.442695, %v340_v27  ;;  %v343_v30 = vsub.f32 %v652_v11, %v331_v28 }
 0x164   : > { %v333_v32 = vpop.xlane.xlu0 %332 }
 0x165   : > { %681 = vpow2.f32 %v348_v29  ;;  %v354_v33 = vmul.f32 1.442695, %v343_v30  ;;  %v344_v34 = vsub.f32 %v301_v10, %v333_v32  ;;  %v720_v32 = vmov 0.0  }
 0x166   : > { %v339_v35 = vpop.xlane.xlu1 %338 }
 0x167   : > { %v356_v36 = vmul.f32 1.442695, %v344_v34  ;;  %683 = vpow2.f32 %v354_v33  ;;  %v347_v62 = vsub.f32 %v764_v12, %v339_v35  ;;  %v629_v33 = vsel %vm438_vm9, 1.0, %v720_v32 }
 0x168   : > { %v327_v38 = vpop.xlane.xlu0 %326 }
 0x169   : > { %685 = vpow2.f32 %v356_v36  ;;  %v341_v39 = vsub.f32 %v288_v13, %v327_v38  ;;  %v362_v2 = vmul.f32 1.442695, %v347_v62 }
 0x16a   : > { %v387_v40 = vpop.permute.xlu1 %386 }
 0x16b   : > { %v350_v41 = vmul.f32 1.442695, %v341_v39  ;;  %vm407_vm1 = vcmp.eq.s32.totalorder %v798_v37, %v387_v40  ;;  %v630_v40 = vsel %vm439_vm10, 1.0, %v720_v32 }
 0x16c   : > { %v337_v42 = vpop.xlane.xlu0 %336  ;;  %v415_v43 = vsel %vm407_vm1, %v341_v39, 0.0  ;;  %vm445_vm1 = vcmp.ge.s32.totalorder %v795_v22, 0 }
 0x16d   : > { %687 = vpow2.f32 %v350_v41  ;;  %v346_v44 = vsub.f32 %v655_v8, %v337_v42  ;;  %v631_v41 = vsel %vm440_vm11, 1.0, %v720_v32 }
 0x16e   : > { %v390_v45 = vpop.permute.xlu1 %389 }
 0x16f   : > { %v360_v46 = vmul.f32 1.442695, %v346_v44  ;;  %vm408_vm4 = vcmp.eq.s32.totalorder %v798_v37, %v390_v45 }
 0x170   : > { %v680_v47 = vpop.eup %679  ;;  %v416_v58 = vsel %vm408_vm4, %v342_v24, 0.0  ;;  %vm539_vm4 = vcmask 1043459  }
 0x171   : > { %689 = vpow2.f32 %v360_v46  ;;  %368 = vadd.xlane.f32.xlu0 %v680_v47  ;;  %v632_v47 = vsel %vm441_vm12, 1.0, %v720_v32 }
 0x172   : > { %v682_v48 = vpop.eup %681  ;;  %v393_v49 = vpop.permute.xlu1 %392 }
 0x173   : > { %vm409_vm2 = vcmp.eq.s32.totalorder %v798_v37, %v393_v49  ;;  %364 = vadd.xlane.f32.xlu1 %v682_v48 }
 0x174   : > { %v417_v50 = vsel %vm409_vm2, %v343_v30, 0.0  ;;  %v684_v51 = vpop.eup %683  ;;  %v384_v54 = vpop.permute.xlu0 %383  ;;  %vm535_vm2 = vcmask 1041409  }
 0x175   : > { %vm406_vm3 = vcmp.eq.s32.totalorder %v798_v37, %v384_v54 }
 0x176   : > { %v686_v52 = vpop.eup %685  ;;  %v414_v56 = vsel %vm406_vm3, %v340_v27, 0.0  ;;  %v396_v57 = vpop.permute.xlu1 %395  ;;  %vm537_vm3 = vcmask 1042434  }
 0x177   : > { %370 = vadd.xlane.f32.xlu1 %v684_v51  ;;  %372 = vadd.xlane.f32.xlu0 %v686_v52  ;;  %vm410_vm5 = vcmp.eq.s32.totalorder %v798_v37, %v396_v57 }
 0x178   : > { %v418_v59 = vsel %vm410_vm5, %v344_v34, 0.0  ;;  %vm542_vm5 = vcmask 3072  }
 0x17a   : > { %v688_v53 = vpop.eup %687  ;;  %v399_v60 = vpop.permute.xlu1 %398 }
 0x17b   : > { %366 = vadd.xlane.f32.xlu0 %v688_v53  ;;  %vm411_vm7 = vcmp.eq.s32.totalorder %v798_v37, %v399_v60  ;;  %v633_v53 = vsel %vm442_vm14, 1.0, %v720_v32  ;;  %v634_v60 = vsel %vm443_vm15, 1.0, %v720_v32 }
 0x17e   : > { %v690_v55 = vpop.eup %689 }
 0x17f   : > { %376 = vadd.xlane.f32.xlu0 %v690_v55 }
 0x183   : > { %422 = vadd.xlane.f32.xlu0 %v414_v56 }
 0x187   : > { %426 = vadd.xlane.f32.xlu0 %v416_v58 }
 0x18b   : > { %430 = vadd.xlane.f32.xlu0 %v418_v59 }
 0x1ab   : > { %v335_v61 = vpop.xlane.xlu1 %334 }
 0x1ac   : > { %v345_v63 = vsub.f32 %v789_v20, %v335_v61 }
 0x1ae   : > { %v358_v0 = vmul.f32 1.442695, %v345_v63  ;;  %v419_v7 = vsel %vm411_vm7, %v345_v63, 0.0 }
 0x1af   : > { %v402_v1 = vpop.permute.xlu1 %401 }
 0x1b0   : > { %691 = vpow2.f32 %v358_v0  ;;  %vm412_vm6 = vcmp.eq.s32.totalorder %v798_v37, %v402_v1 }
 0x1b1   : > { %v420_v3 = vsel %vm412_vm6, %v346_v44, 0.0  ;;  %693 = vpow2.f32 %v362_v2 }
 0x1b2   : > { %434 = vadd.xlane.f32.xlu0 %v420_v3  ;;  %v635_v3 = vsel %vm444_vm0, 1.0, %v720_v32 }
 0x1b3   : > { %v405_v6 = vpop.permute.xlu1 %404 }
 0x1b4   : > { %vm413_vm8 = vcmp.eq.s32.totalorder %v798_v37, %v405_v6 }
 0x1b5   : > { %v421_v8 = vsel %vm413_vm8, %v347_v62, 0.0 }
 0x1bd   : > { %v692_v4 = vpop.eup %691 }
 0x1be   : > { %374 = vadd.xlane.f32.xlu1 %v692_v4  ;;  %v694_v5 = vpop.eup %693 }
 0x1c2   : > { %378 = vadd.xlane.f32.xlu1 %v694_v5 }
 0x1c6   : > { %424 = vadd.xlane.f32.xlu1 %v415_v43 }
 0x1ca   : > { %428 = vadd.xlane.f32.xlu1 %v417_v50 }
 0x1ce   : > { %432 = vadd.xlane.f32.xlu1 %v419_v7 }
 0x1d2   : > { %436 = vadd.xlane.f32.xlu1 %v421_v8  ;;  %v636_v8 = vsel %vm445_vm1, 1.0, %v720_v32 }
 0x1fa   : > { %v369_v9 = vpop.xlane.xlu0 %368 }
 0x1fc   : > { %v365_v11 = vpop.xlane.xlu1 %364 }
 0x1fd   : > { %695 = vlog2.f32 %v365_v11 }
 0x1fe   : > { %697 = vlog2.f32 %v369_v9 }
 0x200   : > { %v373_v10 = vpop.xlane.xlu0 %372  ;;  %v371_v13 = vpop.xlane.xlu1 %370 }
 0x204   : > { %v367_v12 = vpop.xlane.xlu0 %366 }
 0x205   : > { %699 = vlog2.f32 %v367_v12 }
 0x206   : > { %701 = vlog2.f32 %v371_v13 }
 0x207   : > { %703 = vlog2.f32 %v373_v10 }
 0x208   : > { %v377_v20 = vpop.xlane.xlu0 %376 }
 0x209   : > { %705 = vlog2.f32 %v377_v20 }
 0x20a   : > { %v696_v23 = vpop.eup %695 }
 0x20b   : > { %v463_v26 = vmul.f32 0.6931472, %v696_v23  ;;  %v698_v27 = vpop.eup %697 }
 0x20c   : > { %v423_v24 = vpop.xlane.xlu0 %422  ;;  %v467_v34 = vmul.f32 0.6931472, %v698_v27 }
 0x20d   : > { %v478_v31 = vsub.f32 %v463_v26, %v423_v24 }
 0x20f   : > { %v486_v17 = vmul.f32 %v629_v33, %v478_v31 }
 0x210   : > { %v427_v29 = vpop.xlane.xlu0 %426 }
 0x211   : > { %v480_v38 = vsub.f32 %v467_v34, %v427_v29  ;;  %v495_v49 = vsel %vm494_vm13, %v486_v17, 0.0 }
 0x212   : > { %v700_v28 = vpop.eup %699 }
 0x213   : > { %v702_v35 = vpop.eup %701  ;;  %v465_v36 = vmul.f32 0.6931472, %v700_v28  ;;  %v488_v46 = vmul.f32 %v631_v41, %v480_v38 }
 0x214   : > { %v704_v37 = vpop.eup %703  ;;  %v431_v14 = vpop.xlane.xlu0 %430  ;;  %v469_v44 = vmul.f32 0.6931472, %v702_v35 }
 0x215   : > { %v471_v43 = vmul.f32 0.6931472, %v704_v37  ;;  %v504_v58 = vsel %vm494_vm13, %v488_v46, 0.0 }
 0x216   : > { %v706_v45 = vpop.eup %705 }
 0x217   : > { %v482_v50 = vsub.f32 %v471_v43, %v431_v14  ;;  %v475_v18 = vmul.f32 0.6931472, %v706_v45 }
 0x219   : > { %v490_v62 = vmul.f32 %v633_v53, %v482_v50 }
 0x21b   : > { %v513_v19 = vsel %vm494_vm13, %v490_v62, 0.0 }
 0x23b   : > { %v435_v54 = vpop.xlane.xlu0 %434 }
 0x23c   : > { %v484_v63 = vsub.f32 %v475_v18, %v435_v54 }
 0x23e   : > { %v492_v10 = vmul.f32 %v635_v3, %v484_v63 }
 0x240   : > { %v522_v27 = vsel %vm494_vm13, %v492_v10, 0.0 }
 0x247   : > { %v375_v25 = vpop.xlane.xlu1 %374 }
 0x248   : > { %707 = vlog2.f32 %v375_v25 }
 0x24b   : > { %v379_v30 = vpop.xlane.xlu1 %378 }
 0x24c   : > { %709 = vlog2.f32 %v379_v30 }
 0x24f   : > { %v425_v39 = vpop.xlane.xlu1 %424 }
 0x250   : > { %v479_v42 = vsub.f32 %v465_v36, %v425_v39 }
 0x252   : > { %v487_v15 = vmul.f32 %v630_v40, %v479_v42 }
 0x253   : > { %v429_v48 = vpop.xlane.xlu1 %428 }
 0x254   : > { %v496_v16 = vsel %vm494_vm13, %v487_v15, 0.0  ;;  %v481_v51 = vsub.f32 %v469_v44, %v429_v48 }
 0x255   : > { %v708_v52 = vpop.eup %707  ;;  %v497_v55 = vadd.f32 %v496_v16, %v495_v49 }
 0x256   : > { %v489_v56 = vmul.f32 %v632_v47, %v481_v51  ;;  %v473_v57 = vmul.f32 0.6931472, %v708_v52 }
 0x257   : > { %v498_v59 = vrot.slane %v497_v55, 4  ;;  %v433_v61 = vpop.xlane.xlu1 %432 }
 0x258   : > { %v505_v0 = vsel %vm494_vm13, %v489_v56, 0.0  ;;  %v483_v1 = vsub.f32 %v473_v57, %v433_v61 }
 0x259   : > { %v710_v2 = vpop.eup %709  ;;  %v506_v21 = vadd.f32 %v505_v0, %v504_v58  ;;  %v499_v6 = vadd.f32 %v498_v59, %v497_v55 }
 0x25a   : > { %v491_v4 = vmul.f32 %v634_v60, %v483_v1  ;;  %v477_v5 = vmul.f32 0.6931472, %v710_v2 }
 0x25b   : > { %v507_v7 = vrot.slane %v506_v21, 4  ;;  %v437_v9 = vpop.xlane.xlu1 %436  ;;  %v500_v24 = vrot.slane %v499_v6, 2 }
 0x25c   : > { %v514_v11 = vsel %vm494_vm13, %v491_v4, 0.0  ;;  %v485_v12 = vsub.f32 %v477_v5, %v437_v9 }
 0x25d   : > { %v508_v13 = vadd.f32 %v507_v7, %v506_v21  ;;  %v515_v20 = vadd.f32 %v514_v11, %v513_v19  ;;  %v501_v31 = vadd.f32 %v500_v24, %v499_v6 }
 0x25e   : > { %v493_v23 = vmul.f32 %v636_v8, %v485_v12 }
 0x25f   : > { %v509_v25 = vrot.slane %v508_v13, 2  ;;  %v516_v26 = vrot.slane %v515_v20, 4  ;;  %v502_v37 = vrot.slane %v501_v31, 1 }
 0x260   : > { %v523_v22 = vsel %vm494_vm13, %v493_v23, 0.0 }
 0x261   : > { %v510_v28 = vadd.f32 %v509_v25, %v508_v13  ;;  %v517_v29 = vadd.f32 %v516_v26, %v515_v20  ;;  %v524_v30 = vadd.f32 %v523_v22, %v522_v27  ;;  %v503_v42 = vadd.f32 %v502_v37, %v501_v31 }
 0x263   : > { %v518_v32 = vrot.slane %v517_v29, 2  ;;  %v525_v33 = vrot.slane %v524_v30, 4  ;;  %v511_v34 = vrot.slane %v510_v28, 1 }
 0x265   : > { %v519_v35 = vadd.f32 %v518_v32, %v517_v29  ;;  %v526_v36 = vadd.f32 %v525_v33, %v524_v30  ;;  %v512_v40 = vadd.f32 %v511_v34, %v510_v28 }
 0x267   : > { %v520_v38 = vrot.slane %v519_v35, 1  ;;  %v527_v39 = vrot.slane %v526_v36, 2  ;;  %v536_v43 = vsel %vm535_vm2, %v512_v40, %v503_v42 }
 0x269   : > { %v528_v17 = vadd.f32 %v527_v39, %v526_v36  ;;  %v521_v41 = vadd.f32 %v520_v38, %v519_v35 }
 0x26b   : > { %v529_v14 = vrot.slane %v528_v17, 1  ;;  %v538_v44 = vsel %vm537_vm3, %v521_v41, %v536_v43 }
 0x26d   : > { %v530_v15 = vadd.f32 %v529_v14, %v528_v17 }
 0x26f   : > { %v540_v45 = vsel %vm539_vm4, %v530_v15, %v538_v44 }
 0x270   : > { %543 = vst.msk [vmem:[%s192_s30] sm:$0xf] %vm542_vm5, %v540_v45 }
 0x271 PF: > { %s13_s12 = sadd.s32 1, %s717_s12  }
 0x272   : > { %p10_p5 = scmp.ge.s32.totalorder %s13_s12, 4  }
 0x274   :  { %12 = sbr.rel (!%p10_p5) target bundleno = 1 (0x1), region = 65 }

</bundles_post_ra>
